<compile_context>
chip_gen: v6e
topology: v6e:2x2x1
jax: 0.10.0
libtpu: 0.0.40
codegen_flags: <defaults>
</compile_context>

<pallas_src>
import functools

import jax
import jax.numpy as jnp
from jax.experimental import pallas as pl
from jax.experimental.pallas import tpu as pltpu


def _round_up(x: int, m: int) -> int:
    return ((x + m - 1) // m) * m


def _cdiv(a: int, b: int) -> int:
    return -(-a // b)


def _resident_spec(block_shape, index_map):
    """Constant-index (weight-resident) block: single-buffered to halve its VMEM footprint."""
    try:
        return pl.BlockSpec(block_shape, index_map, pipeline_mode=pl.Buffered(1))
    except (TypeError, AttributeError):  # older jax without pipeline_mode / Buffered
        return pl.BlockSpec(block_shape, index_map)


def _fused_mlp_kernel(x_ref, *refs, n_layers: int):
    """One (batch_tile, k_tile) grid step.

    refs = (w0, b0, w1, b1, ..., w_{L-1}, b_{L-1}, o_ref, acc_ref).
    Layer 0 is K-tiled and accumulated in f32 scratch; the remaining (small) layers run
    entirely on-chip in the finalize branch. Weights bf16 (MXU), biases/acc f32 (VPU).
    """
    wb = refs[: 2 * n_layers]
    o_ref = refs[2 * n_layers]
    acc_ref = refs[2 * n_layers + 1]

    k = pl.program_id(1)

    @pl.when(k == 0)
    def _init():
        acc_ref[...] = jnp.zeros_like(acc_ref)

    # Layer-0 partial matmul on the MXU, f32 accumulation into VMEM scratch.
    acc_ref[...] += jnp.dot(
        x_ref[...], wb[0][...], preferred_element_type=jnp.float32
    )

    @pl.when(k == pl.num_programs(1) - 1)
    def _finalize():
        y = acc_ref[...] + wb[1][...]                 # layer-0 bias (f32)
        for i in range(1, n_layers):
            h = jnp.maximum(y, 0.0).astype(jnp.bfloat16)   # ReLU (VPU) -> bf16 for MXU
            y = jnp.dot(h, wb[2 * i][...],
                        preferred_element_type=jnp.float32) + wb[2 * i + 1][...]
        o_ref[...] = y.astype(o_ref.dtype)


def _plan_tiling(feats, tm_max=256, out_bytes=4, budget=40 << 20):
    """Static (init-time) tiling plan: lane-dense widths, layer-0 K tile, VMEM limit."""
    feats_p = [_round_up(f, 128) for f in feats]
    n_layers = len(feats) - 1
    n1p, nlp = feats_p[1], feats_p[-1]
    k0p = feats_p[0]

    # Bytes resident regardless of tk (single-buffered constant blocks + scratch + output).
    fixed = n1p * 4                                              # layer-0 bias
    for i in range(1, n_layers):
        fixed += feats_p[i] * feats_p[i + 1] * 2 + feats_p[i + 1] * 4   # hidden W (bf16) + b (f32)
    fixed += tm_max * n1p * 4                                    # f32 accumulator scratch
    fixed += 2 * tm_max * nlp * out_bytes                        # double-buffered output tile

    tk = 128
    for target in (1024, 512, 256, 128):
        k_tiles = _cdiv(k0p, target)
        cand = _round_up(_cdiv(k0p, k_tiles), 128)               # minimal padding for this depth
        per_k = 2 * tm_max * cand * 2 + 2 * cand * n1p * 2       # x + layer-0 W, double-buffered bf16
        if fixed + per_k <= budget:
            tk = cand
            break
    k_tiles = _cdiv(k0p, tk)
    k0_pad = tk * k_tiles

    est = fixed + 2 * tm_max * tk * 2 + 2 * tk * n1p * 2
    # Explicit scoped-VMEM limit: lifts v5e's 16 MiB default, stays under v7x's 64 MiB physical.
    vmem_limit = min(max(2 * est, 32 << 20), 56 << 20)
    if est + (4 << 20) > vmem_limit:
        # TODO(synk): model too large for the v7x-safe cap — also N-tile hidden layers.
        vmem_limit = est + (8 << 20)
    return feats_p, tk, k0_pad, vmem_limit


def _prepare_params(params, feats_p, k0_pad):
    """Pad + cast weights (bf16) and biases (f32) ONCE; layer-0 K padded to a tk multiple."""
    packed = []
    for i, (w, b) in enumerate(params):
        kp = k0_pad if i == 0 else feats_p[i]
        np_ = feats_p[i + 1]
        w_p = jnp.zeros((kp, np_), jnp.bfloat16).at[: w.shape[0], : w.shape[1]].set(
            w.astype(jnp.bfloat16))
        b_p = jnp.zeros((1, np_), jnp.float32).at[0, : b.shape[0]].set(
            b.astype(jnp.float32))
        packed += [w_p, b_p]
    return tuple(packed)


def fused_mlp_forward(x, packed, *, feats, feats_p, k0_pad, tk, vmem_limit_bytes, out_dtype):
    """x: (B, ...) -> flatten -> fused MLP. packed = pre-padded (w0,b0,w1,b1,...)."""
    n_layers = len(feats) - 1
    B = x.shape[0]
    h = x.reshape(B, -1)
    assert h.shape[1] == feats[0], (h.shape, feats)

    # Batch tiling: up to 256 rows/tile (fills the 256x256 MXU on v6e/v7x), min 8 sublanes.
    tm = min(256, _round_up(B, 8))
    b_pad = _round_up(B, tm)
    # Single fused pad + bf16 cast under jit (no zero-slab scatter through HBM).
    x_p = jnp.pad(h.astype(jnp.bfloat16), ((0, b_pad - B), (0, k0_pad - feats[0])))

    n1p, nlp = feats_p[1], feats_p[-1]
    b_tiles = b_pad // tm
    k_tiles = k0_pad // tk

    flat_in = [x_p, packed[0], packed[1]]
    in_specs = [
        pl.BlockSpec((tm, tk), lambda m, k: (m, k)),        # activations: (batch, K) tiles
        pl.BlockSpec((tk, n1p), lambda m, k: (k, 0)),       # layer-0 weight: K-streamed (dbl-buffered)
        _resident_spec((1, n1p), lambda m, k: (0, 0)),      # layer-0 bias: resident, single-buffered
    ]
    for i in range(1, n_layers):
        kp, np_ = feats_p[i], feats_p[i + 1]
        flat_in += [packed[2 * i], packed[2 * i + 1]]
        in_specs += [
            _resident_spec((kp, np_), lambda m, k: (0, 0)),  # resident hidden weight
            _resident_spec((1, np_), lambda m, k: (0, 0)),   # resident hidden bias
        ]

    out_p = pl.pallas_call(
        functools.partial(_fused_mlp_kernel, n_layers=n_layers),
        out_shape=jax.ShapeDtypeStruct((b_pad, nlp), out_dtype),
        grid=(b_tiles, k_tiles),                             # reduction (k) axis last
        in_specs=in_specs,
        out_specs=pl.BlockSpec((tm, nlp), lambda m, k: (m, 0)),
        scratch_shapes=[pltpu.VMEM((tm, n1p), jnp.float32)],  # layer-0 f32 accumulator
        compiler_params=pltpu.CompilerParams(
            # batch tiles shard across TCs on v7x; k is a sequential reduction.
            dimension_semantics=("parallel", "arbitrary"),
            vmem_limit_bytes=int(vmem_limit_bytes),
        ),
    )(*flat_in)

    return out_p[:B, : feats[-1]]


class MLPDecoderPallas:
    """JAX/Pallas re-implementation of the PyTorch MLPDecoder (Flatten + Linear/ReLU stack)."""

    def __init__(self, features, key, out_dtype=jnp.float32):
        self.features = tuple(int(f) for f in features)
        self.params = []
        for i in range(len(features) - 1):
            key, wk, bk = jax.random.split(key, 3)
            bound = 1.0 / float(features[i]) ** 0.5
            # PyTorch nn.Linear default init: U(-1/sqrt(fan_in), 1/sqrt(fan_in)).
            # Weight stored (in_features, out_features) = transpose of torch layout.
            w = jax.random.uniform(
                wk, (features[i], features[i + 1]), jnp.float32, -bound, bound)
            b = jax.random.uniform(
                bk, (features[i + 1],), jnp.float32, -bound, bound)
            self.params.append((w, b))

        feats = list(self.features)
        feats_p, tk, k0_pad, vmem_limit = _plan_tiling(
            feats, out_bytes=jnp.dtype(out_dtype).itemsize)
        # Pad/cast weights once at init; per-call forward only streams them into the kernel.
        self._packed = _prepare_params(self.params, feats_p, k0_pad)
        self._forward = jax.jit(functools.partial(
            fused_mlp_forward,
            feats=tuple(feats), feats_p=tuple(feats_p),
            k0_pad=k0_pad, tk=tk,
            vmem_limit_bytes=vmem_limit, out_dtype=out_dtype))

    def __call__(self, x):
        return self._forward(x, self._packed)


def reference_mlp(x, params):
    """Pure-JAX reference (emulates bf16 MXU inputs / f32 accumulation)."""
    B = x.shape[0]
    h = x.reshape(B, -1).astype(jnp.bfloat16)
    out = None
    for idx, (w, b) in enumerate(params):
        y = jnp.dot(h, w.astype(jnp.bfloat16),
                    preferred_element_type=jnp.float32) + b.reshape(1, -1)
        if idx < len(params) - 1:
            h = jnp.maximum(y, 0.0).astype(jnp.bfloat16)
        else:
            out = y
    return out


if __name__ == "__main__":
    key = jax.random.PRNGKey(0)
    k_in, k_model = jax.random.split(key)

    # Small shapes: batch=2, channels=4, seq=16 -> flattened features[0] = 64.
    B, C, T = 2, 4, 16
    features = [C * T, 32, 16, 8]

    x = jax.random.normal(k_in, (B, C, T), dtype=jnp.float32)

    model = MLPDecoderPallas(features, k_model)
    out = jax.block_until_ready(model(x))

    ref = reference_mlp(x, model.params)
    assert out.shape == (B, features[-1]), out.shape
    assert jnp.allclose(out, ref, atol=1e-2, rtol=1e-2), "mismatch vs reference"

    print("KERNEL_OK")
</pallas_src>

<mosaic_0001>
module attributes {stable_mosaic.version = 11 : i64} {
  func.func @_fused_mlp_kernel(%arg0: i32, %arg1: i32, %arg2: memref<8x128xbf16, #tpu.memory_space<vmem>>, %arg3: memref<128x128xbf16, #tpu.memory_space<vmem>>, %arg4: memref<1x128xf32, #tpu.memory_space<vmem>>, %arg5: memref<128x128xbf16, #tpu.memory_space<vmem>>, %arg6: memref<1x128xf32, #tpu.memory_space<vmem>>, %arg7: memref<128x128xbf16, #tpu.memory_space<vmem>>, %arg8: memref<1x128xf32, #tpu.memory_space<vmem>>, %arg9: memref<8x128xf32, #tpu.memory_space<vmem>>, %arg10: memref<8x128xf32, #tpu.memory_space<vmem>>) attributes {dimension_semantics = [#tpu.dimension_semantics<parallel>, #tpu.dimension_semantics<arbitrary>], iteration_bounds = array<i64: 1, 1>, scalar_prefetch = 0 : i64, scratch_operands = 1 : i64, tpu.core_type = #tpu.core_type<tc>, window_params = [{transform_indices = @transform_0, window_bounds = array<i64: 8, 128>}, {transform_indices = @transform_1, window_bounds = array<i64: 128, 128>}, {pipeline_mode = #tpu.pipeline_mode<synchronous>, transform_indices = @transform_2, window_bounds = array<i64: 1, 128>}, {pipeline_mode = #tpu.pipeline_mode<synchronous>, transform_indices = @transform_3, window_bounds = array<i64: 128, 128>}, {pipeline_mode = #tpu.pipeline_mode<synchronous>, transform_indices = @transform_4, window_bounds = array<i64: 1, 128>}, {pipeline_mode = #tpu.pipeline_mode<synchronous>, transform_indices = @transform_5, window_bounds = array<i64: 128, 128>}, {pipeline_mode = #tpu.pipeline_mode<synchronous>, transform_indices = @transform_6, window_bounds = array<i64: 1, 128>}, {transform_indices = @transform_7, window_bounds = array<i64: 8, 128>}]} {
    %c0_i32 = arith.constant 0 : i32
    %0 = arith.cmpi eq, %arg1, %c0_i32 : i32
    %1 = arith.extui %0 : i1 to i32
    %c0_i32_0 = arith.constant 0 : i32
    %2 = arith.cmpi ne, %1, %c0_i32_0 : i32
    scf.if %2 {
      %cst_10 = arith.constant 0.000000e+00 : f32
      %12 = vector.broadcast %cst_10 : f32 to vector<8x128xf32>
      %c0_11 = arith.constant 0 : index
      %c0_12 = arith.constant 0 : index
      %13 = vector.load %arg10[%c0_11, %c0_12] : memref<8x128xf32, #tpu.memory_space<vmem>>, vector<8x128xf32>
      tpu.vector_store %arg10[%c0_11, %c0_12], %12 {strides = array<i32>} : memref<8x128xf32, #tpu.memory_space<vmem>>, vector<8x128xf32>,
    } else {
    }
    %c0 = arith.constant 0 : index
    %c0_1 = arith.constant 0 : index
    %3 = vector.load %arg10[%c0, %c0_1] : memref<8x128xf32, #tpu.memory_space<vmem>>, vector<8x128xf32>
    %c0_2 = arith.constant 0 : index
    %c0_3 = arith.constant 0 : index
    %4 = vector.load %arg2[%c0_2, %c0_3] : memref<8x128xbf16, #tpu.memory_space<vmem>>, vector<8x128xbf16>
    %c0_4 = arith.constant 0 : index
    %c0_5 = arith.constant 0 : index
    %5 = vector.load %arg3[%c0_4, %c0_5] : memref<128x128xbf16, #tpu.memory_space<vmem>>, vector<128x128xbf16>
    %cst = arith.constant dense<0.000000e+00> : vector<8x128xf32>
    %6 = tpu.matmul %4, %5, %cst {dimension_numbers = #tpu.dot_dimension_numbers<[1], [0], [0], [1], [0, 0, 1, 1], [], []>} : vector<8x128xbf16>, vector<128x128xbf16>, vector<8x128xf32> -> vector<8x128xf32>
    %7 = arith.addf %3, %6 : vector<8x128xf32>
    %c0_6 = arith.constant 0 : index
    %c0_7 = arith.constant 0 : index
    %8 = vector.load %arg10[%c0_6, %c0_7] : memref<8x128xf32, #tpu.memory_space<vmem>>, vector<8x128xf32>
    tpu.vector_store %arg10[%c0_6, %c0_7], %7 {strides = array<i32>} : memref<8x128xf32, #tpu.memory_space<vmem>>, vector<8x128xf32>,
    %c0_i32_8 = arith.constant 0 : i32
    %9 = arith.cmpi eq, %arg1, %c0_i32_8 : i32
    %10 = arith.extui %9 : i1 to i32
    %c0_i32_9 = arith.constant 0 : i32
    %11 = arith.cmpi ne, %10, %c0_i32_9 : i32
    scf.if %11 {
      %c0_10 = arith.constant 0 : index
      %c0_11 = arith.constant 0 : index
      %12 = vector.load %arg10[%c0_10, %c0_11] : memref<8x128xf32, #tpu.memory_space<vmem>>, vector<8x128xf32>
      %c0_12 = arith.constant 0 : index
      %c0_13 = arith.constant 0 : index
      %13 = vector.load %arg4[%c0_12, %c0_13] : memref<1x128xf32, #tpu.memory_space<vmem>>, vector<1x128xf32>
      %14 = vector.broadcast %13 : vector<1x128xf32> to vector<8x128xf32>
      %15 = arith.addf %12, %14 : vector<8x128xf32>
      %cst_14 = arith.constant 0.000000e+00 : f32
      %16 = vector.broadcast %cst_14 : f32 to vector<8x128xf32>
      %17 = arith.maximumf %15, %16 : vector<8x128xf32>
      %18 = arith.truncf %17 : vector<8x128xf32> to vector<8x128xbf16>
      %c0_15 = arith.constant 0 : index
      %c0_16 = arith.constant 0 : index
      %19 = vector.load %arg5[%c0_15, %c0_16] : memref<128x128xbf16, #tpu.memory_space<vmem>>, vector<128x128xbf16>
      %cst_17 = arith.constant dense<0.000000e+00> : vector<8x128xf32>
      %20 = tpu.matmul %18, %19, %cst_17 {dimension_numbers = #tpu.dot_dimension_numbers<[1], [0], [0], [1], [0, 0, 1, 1], [], []>} : vector<8x128xbf16>, vector<128x128xbf16>, vector<8x128xf32> -> vector<8x128xf32>
      %c0_18 = arith.constant 0 : index
      %c0_19 = arith.constant 0 : index
      %21 = vector.load %arg6[%c0_18, %c0_19] : memref<1x128xf32, #tpu.memory_space<vmem>>, vector<1x128xf32>
      %22 = vector.broadcast %21 : vector<1x128xf32> to vector<8x128xf32>
      %23 = arith.addf %20, %22 : vector<8x128xf32>
      %cst_20 = arith.constant 0.000000e+00 : f32
      %24 = vector.broadcast %cst_20 : f32 to vector<8x128xf32>
      %25 = arith.maximumf %23, %24 : vector<8x128xf32>
      %26 = arith.truncf %25 : vector<8x128xf32> to vector<8x128xbf16>
      %c0_21 = arith.constant 0 : index
      %c0_22 = arith.constant 0 : index
      %27 = vector.load %arg7[%c0_21, %c0_22] : memref<128x128xbf16, #tpu.memory_space<vmem>>, vector<128x128xbf16>
      %cst_23 = arith.constant dense<0.000000e+00> : vector<8x128xf32>
      %28 = tpu.matmul %26, %27, %cst_23 {dimension_numbers = #tpu.dot_dimension_numbers<[1], [0], [0], [1], [0, 0, 1, 1], [], []>} : vector<8x128xbf16>, vector<128x128xbf16>, vector<8x128xf32> -> vector<8x128xf32>
      %c0_24 = arith.constant 0 : index
      %c0_25 = arith.constant 0 : index
      %29 = vector.load %arg8[%c0_24, %c0_25] : memref<1x128xf32, #tpu.memory_space<vmem>>, vector<1x128xf32>
      %30 = vector.broadcast %29 : vector<1x128xf32> to vector<8x128xf32>
      %31 = arith.addf %28, %30 : vector<8x128xf32>
      %c0_26 = arith.constant 0 : index
      %c0_27 = arith.constant 0 : index
      %32 = vector.load %arg9[%c0_26, %c0_27] : memref<8x128xf32, #tpu.memory_space<vmem>>, vector<8x128xf32>
      tpu.vector_store %arg9[%c0_26, %c0_27], %31 {strides = array<i32>} : memref<8x128xf32, #tpu.memory_space<vmem>>, vector<8x128xf32>,
    } else {
    }
    return
  }
  func.func @transform_0(%arg0: i32, %arg1: i32) -> (i32, i32) {
    %c0_i32 = arith.constant 0 : i32
    return %arg0, %arg1 : i32, i32
  }
  func.func @transform_1(%arg0: i32, %arg1: i32) -> (i32, i32) {
    %c0_i32 = arith.constant 0 : i32
    %c0_i32_0 = arith.constant 0 : i32
    return %arg1, %c0_i32 : i32, i32
  }
  func.func @transform_2(%arg0: i32, %arg1: i32) -> (i32, i32) {
    %c0_i32 = arith.constant 0 : i32
    %c0_i32_0 = arith.constant 0 : i32
    %c0_i32_1 = arith.constant 0 : i32
    return %c0_i32, %c0_i32_0 : i32, i32
  }
  func.func @transform_3(%arg0: i32, %arg1: i32) -> (i32, i32) {
    %c0_i32 = arith.constant 0 : i32
    %c0_i32_0 = arith.constant 0 : i32
    %c0_i32_1 = arith.constant 0 : i32
    return %c0_i32, %c0_i32_0 : i32, i32
  }
  func.func @transform_4(%arg0: i32, %arg1: i32) -> (i32, i32) {
    %c0_i32 = arith.constant 0 : i32
    %c0_i32_0 = arith.constant 0 : i32
    %c0_i32_1 = arith.constant 0 : i32
    return %c0_i32, %c0_i32_0 : i32, i32
  }
  func.func @transform_5(%arg0: i32, %arg1: i32) -> (i32, i32) {
    %c0_i32 = arith.constant 0 : i32
    %c0_i32_0 = arith.constant 0 : i32
    %c0_i32_1 = arith.constant 0 : i32
    return %c0_i32, %c0_i32_0 : i32, i32
  }
  func.func @transform_6(%arg0: i32, %arg1: i32) -> (i32, i32) {
    %c0_i32 = arith.constant 0 : i32
    %c0_i32_0 = arith.constant 0 : i32
    %c0_i32_1 = arith.constant 0 : i32
    return %c0_i32, %c0_i32_0 : i32, i32
  }
  func.func @transform_7(%arg0: i32, %arg1: i32) -> (i32, i32) {
    %c0_i32 = arith.constant 0 : i32
    %c0_i32_0 = arith.constant 0 : i32
    return %arg0, %c0_i32 : i32, i32
  }
}

</mosaic_0001>

<bundles_post_ra>
// kernel: fused_mlp_forward.1
= control target key start
LH: loop header
LB: loop body
LE: loop exit
PB: predicated region body
PF: predicated region fallthrough
CT: control target
= control target key end

     0   :  { %12 = vsyncpa [#allocation4], 0  ;;  %s736_s0 = inlined_call_operand.vmem [shape: bf16[8,128], index: 0, kind: input, shape index: {}]   ;;  %s737_s1 = inlined_call_operand.hbm [shape: bf16[128,128], index: 1, kind: input, shape index: {}]   ;;  %s738_s2 = inlined_call_operand.vmem [shape: f32[1,128], index: 2, kind: input, shape index: {}]   ;;  %s739_s3 = inlined_call_operand.hbm [shape: bf16[128,128], index: 3, kind: input, shape index: {}]   ;;  %s740_s4 = inlined_call_operand.vmem [shape: f32[1,128], index: 4, kind: input, shape index: {}]   ;;  %s741_s5 = inlined_call_operand.hbm [shape: bf16[128,128], index: 5, kind: input, shape index: {}]   ;;  %s742_s6 = inlined_call_operand.vmem [shape: f32[1,128], index: 6, kind: input, shape index: {}]   ;;  %s743_s7 = inlined_call_operand.vmem [shape: f32[8,128], index: 7, kind: output, shape index: {}]  }
   0x1   :  { %13 = vsyncpa [#allocation6], 0  ;;  %s635_s24 = smov [#allocation5]   ;;  %s636_s26 = smov [#allocation3]  }
   0x2   :  { %s35_s25 = sshll.u32 %s635_s24, 4  ;;  %s21_s27 = sshll.u32 %s636_s26, 4  ;;  %s36_s25 = int_to_ptr.vmem [resolvable:$true] %s35_s25  ;;  %s22_s27 = int_to_ptr.vmem [resolvable:$true] %s21_s27 }
   0x3   :  { %s579_s28 = scalar_lea.vmem %s36_s25, 1024  ;;  %p584_p1 = scmp.lt.s32.totalorder %s36_s25, %s36_s25 }
   0x4   :  { %p580_p0 = scmp.ne.s32.totalorder %s36_s25, %s579_s28  ;;  %p585_p2 = scmp.lt.s32.totalorder %s579_s28, %s579_s28 }
   0x6   :  { %p586_p3 = por %p585_p2, %p584_p1 }
   0x8   :  { %p587_p4 = pnand %p586_p3, %p580_p0 }
   0xa   :  { %590 = shalt.err (!%p587_p4)
}
   0xb   :  { %s637_s29 = smov 64   ;;  %s638_s30 = smov 4  }
   0xc   :  { %41 = dma.hbm_to_vmem [thread:$0]  %s739_s3, 1024, %s36_s25, [#allocation6], %s637_s29, %s637_s29, %s638_s30  }
   0xd   :  { %s599_s10 = scalar_lea.vmem %s22_s27, 1024  ;;  %p604_p6 = scmp.lt.s32.totalorder %s22_s27, %s22_s27 }
   0xe   :  { %p600_p5 = scmp.ne.s32.totalorder %s22_s27, %s599_s10  ;;  %p605_p7 = scmp.lt.s32.totalorder %s599_s10, %s599_s10 }
  0x10   :  { %p606_p8 = por %p605_p7, %p604_p6 }
  0x12   :  { %p607_p9 = pnand %p606_p8, %p600_p5 }
  0x14   :  { %610 = shalt.err (!%p607_p9)
}
  0x15   :  { %27 = dma.hbm_to_vmem [thread:$0]  %s737_s1, 1024, %s22_s27, [#allocation4], %s637_s29, %s637_s29, %s638_s30  }
  0x16   :  { %s639_s13 = smov [#allocation7]  }
  0x17   :  { %s49_s14 = sshll.u32 %s639_s13, 4  ;;  %s50_s14 = int_to_ptr.vmem [resolvable:$true] %s49_s14 }
  0x18   :  { %s619_s15 = scalar_lea.vmem %s50_s14, 1024  ;;  %p624_p11 = scmp.lt.s32.totalorder %s50_s14, %s50_s14 }
  0x19   :  { %p620_p10 = scmp.ne.s32.totalorder %s50_s14, %s619_s15  ;;  %p625_p12 = scmp.lt.s32.totalorder %s619_s15, %s619_s15 }
  0x1b   :  { %p626_p13 = por %p625_p12, %p624_p11 }
  0x1d   :  { %p627_p0 = pnand %p626_p13, %p620_p10 }
  0x1f   :  { %630 = shalt.err (!%p627_p0)
}
  0x20   :  { %55 = dma.hbm_to_vmem [thread:$0]  %s741_s5, 1024, %s50_s14, [#allocation6], %s637_s29, %s637_s29, %s638_s30  }
  0x21   :  { %631 = dma.done.wait [#allocation4], 1024  }
  0x22   :  { %632 = vsyncadd [#allocation4], 4294966272 }
  0x23   :  { %633 = dma.done.wait [#allocation6], 2048  }
  0x24   :  { %634 = vsyncadd [#allocation6], 4294965248  ;;  %v640_v0 = vmov 0.0   ;;  %vm641_vm0 = vmmov 0   ;;  %v547_v1 = vld [vmem:[#allocation3 + $0x38] sm:$0xff]   ;;  %v548_v2 = vld [vmem:[#allocation3 + $0x30] sm:$0xff]  }
  0x25   :  { %480 = vmatprep.subr.bf16.mxu0 %v640_v0  ;;  %496 = vmatprep.mubr.msk.bf16.mxu0 %vm641_vm0, %v640_v0  ;;  %v549_v3 = vld [vmem:[#allocation3 + $0x28] sm:$0xff]   ;;  %v555_v4 = vld [vmem:[#allocation5 + $0x38] sm:$0xff]   ;;  %v550_v5 = vld [vmem:[#allocation3 + $0x20] sm:$0xff]  }
  0x26   :  { %500 = vmatprep.subr.bf16.mxu1 %v640_v0  ;;  %516 = vmatprep.mubr.msk.bf16.mxu1 %vm641_vm0, %v640_v0  ;;  %v556_v6 = vld [vmem:[#allocation5 + $0x30] sm:$0xff]   ;;  %v551_v7 = vld [vmem:[#allocation3 + $0x18] sm:$0xff]   ;;  %v557_v8 = vld [vmem:[#allocation5 + $0x28] sm:$0xff]  }
  0x27   :  { %481 = vmatpush3.bf16.msra.mxu0 %v547_v1  ;;  %501 = vmatpush3.bf16.msra.mxu1 %v555_v4  ;;  %v552_v9 = vld [vmem:[#allocation3 + $0x10] sm:$0xff]   ;;  %v558_v10 = vld [vmem:[#allocation5 + $0x20] sm:$0xff]   ;;  %v553_v11 = vld [vmem:[#allocation3 + $0x8] sm:$0xff]  }
  0x28   :  { %482 = vmatprep.subr.bf16.mxu0 %v640_v0  ;;  %502 = vmatprep.subr.bf16.mxu1 %v640_v0  ;;  %v559_v12 = vld [vmem:[#allocation5 + $0x18] sm:$0xff]   ;;  %v554_v13 = vld [vmem:[#allocation3] sm:$0xff]   ;;  %v560_v14 = vld [vmem:[#allocation5 + $0x10] sm:$0xff]  }
  0x29   :  { %v74_v15 = vld [vmem:[%s736_s0] sm:$0xf]  ;;  %v561_v16 = vld [vmem:[#allocation5 + $0x8] sm:$0xff]   ;;  %v563_v18 = vld [vmem:[#allocation7 + $0x38] sm:$0xff]  }
  0x2a   :  { %v562_v17 = vld [vmem:[#allocation5] sm:$0xff]   ;;  %v564_v19 = vld [vmem:[#allocation7 + $0x30] sm:$0xff]   ;;  %v565_v20 = vld [vmem:[#allocation7 + $0x28] sm:$0xff]  }
  0x2b   :  { %483 = vmatpush3.bf16.msra.mxu0 %v548_v2  ;;  %503 = vmatpush3.bf16.msra.mxu1 %v556_v6  ;;  %v566_v21 = vld [vmem:[#allocation7 + $0x20] sm:$0xff]   ;;  %v567_v22 = vld [vmem:[#allocation7 + $0x18] sm:$0xff]   ;;  %v568_v23 = vld [vmem:[#allocation7 + $0x10] sm:$0xff]  }
  0x2c   :  { %484 = vmatprep.subr.bf16.mxu0 %v640_v0  ;;  %504 = vmatprep.subr.bf16.mxu1 %v640_v0  ;;  %v434_v24 = vld [vmem:[%s738_s2] ss:$0 sm:$0xff]  ;;  %v569_v32 = vld [vmem:[#allocation7 + $0x8] sm:$0xff]  }
  0x2d   :  { %v570_v33 = vld [vmem:[#allocation7] sm:$0xff]  }
  0x2e   :  { %v435_v34 = vld [vmem:[%s740_s4] ss:$0 sm:$0xff] }
  0x2f   :  { %485 = vmatpush3.bf16.msra.mxu0 %v549_v3  ;;  %505 = vmatpush3.bf16.msra.mxu1 %v557_v8  ;;  %v444_v42 = vld [vmem:[%s742_s6] ss:$0 sm:$0xff] }
  0x30   :  { %486 = vmatprep.subr.bf16.mxu0 %v640_v0  ;;  %506 = vmatprep.subr.bf16.mxu1 %v640_v0 }
  0x33   :  { %487 = vmatpush3.bf16.msra.mxu0 %v550_v5  ;;  %507 = vmatpush3.bf16.msra.mxu1 %v558_v10 }
  0x34   :  { %488 = vmatprep.subr.bf16.mxu0 %v640_v0  ;;  %508 = vmatprep.subr.bf16.mxu1 %v640_v0 }
  0x37   :  { %489 = vmatpush3.bf16.msra.mxu0 %v551_v7  ;;  %509 = vmatpush3.bf16.msra.mxu1 %v559_v12 }
  0x38   :  { %490 = vmatprep.subr.bf16.mxu0 %v640_v0  ;;  %510 = vmatprep.subr.bf16.mxu1 %v640_v0 }
  0x3b   :  { %491 = vmatpush3.bf16.msra.mxu0 %v552_v9  ;;  %511 = vmatpush3.bf16.msra.mxu1 %v560_v14 }
  0x3c   :  { %492 = vmatprep.subr.bf16.mxu0 %v640_v0  ;;  %512 = vmatprep.subr.bf16.mxu1 %v640_v0 }
  0x3f   :  { %493 = vmatpush3.bf16.msra.mxu0 %v553_v11  ;;  %513 = vmatpush3.bf16.msra.mxu1 %v561_v16 }
  0x40   :  { %494 = vmatprep.subr.bf16.mxu0 %v640_v0  ;;  %514 = vmatprep.subr.bf16.mxu1 %v640_v0 }
  0x43   :  { %495 = vmatpush3.bf16.msra.mxu0 %v554_v13  ;;  %515 = vmatpush3.bf16.msra.mxu1 %v562_v17 }
  0x44   :  { %520 = vmatprep.subr.bf16.mxu0 %v640_v0 }
  0x46   :  { %497 = vmatmul.mubr.bf16.vlgmr.msra.gmra.mxu0 %v74_v15 }
  0x47   :  { %536 = vmatprep.mubr.msk.bf16.mxu0 %vm641_vm0, %v640_v0  ;;  %521 = vmatpush3.bf16.msra.mxu0 %v563_v18 }
  0x48   :  { %522 = vmatprep.subr.bf16.mxu0 %v640_v0 }
  0x4b   :  { %523 = vmatpush3.bf16.msra.mxu0 %v564_v19 }
  0x4c   :  { %524 = vmatprep.subr.bf16.mxu0 %v640_v0 }
  0x4f   :  { %525 = vmatpush3.bf16.msra.mxu0 %v565_v20 }
  0x50   :  { %526 = vmatprep.subr.bf16.mxu0 %v640_v0 }
  0x53   :  { %527 = vmatpush3.bf16.msra.mxu0 %v566_v21 }
  0x54   :  { %528 = vmatprep.subr.bf16.mxu0 %v640_v0 }
  0x57   :  { %529 = vmatpush3.bf16.msra.mxu0 %v567_v22 }
  0x58   :  { %530 = vmatprep.subr.bf16.mxu0 %v640_v0 }
  0x5b   :  { %531 = vmatpush3.bf16.msra.mxu0 %v568_v23 }
  0x5c   :  { %532 = vmatprep.subr.bf16.mxu0 %v640_v0 }
  0x5f   :  { %533 = vmatpush3.bf16.msra.mxu0 %v569_v32 }
  0x60   :  { %534 = vmatprep.subr.bf16.mxu0 %v640_v0 }
  0x63   :  { %535 = vmatpush3.bf16.msra.mxu0 %v570_v33 }
 0x106   :  { %v173_v25 = vpop.f32.mrf.mxu0 }
 0x107   :  { %v192_v26 = vadd.f32 %v434_v24, %v173_v25 }
 0x108   :  { %v498_v27 = vpop.f32.mrf.mxu0 }
 0x109   :  { %v193_v28 = vmax.f32 %v192_v26, 0.0 }
 0x10a   :  { %v176_v29 = vpop.f32.mrf.mxu0 }
 0x10b   :  { %v194_v30 = vpack.c.bf16 %v193_v28, %v193_v28 }
 0x10c   :  { %v499_v31 = vpop.f32.mrf.mxu0 }
 0x10d   :  { %517 = vmatmul.mubr.bf16.vlgmr.msra.gmra.mxu1 %v194_v30 }
 0x1cd   :  { %v300_v35 = vpop.f32.mrf.mxu1 }
 0x1ce   :  { %v301_v36 = vadd.f32 %v435_v34, %v300_v35 }
 0x1cf   :  { %v518_v37 = vpop.f32.mrf.mxu1 }
 0x1d0   :  { %v306_v38 = vmax.f32 %v301_v36, 0.0 }
 0x1d1   :  { %v303_v39 = vpop.f32.mrf.mxu1 }
 0x1d2   :  { %v307_v40 = vpack.c.bf16 %v306_v38, %v306_v38 }
 0x1d3   :  { %v519_v41 = vpop.f32.mrf.mxu1 }
 0x1d4   :  { %537 = vmatmul.mubr.bf16.vlgmr.msra.gmra.mxu0 %v307_v40 }
 0x294   :  { %v413_v43 = vpop.f32.mrf.mxu0 }
 0x295   :  { %v414_v44 = vadd.f32 %v444_v42, %v413_v43 }
 0x296   :  { %v538_v45 = vpop.f32.mrf.mxu0 }
 0x297   :  { %419 = vst [vmem:[%s743_s7] sm:$0xff] %v414_v44 }
 0x298   :  { %v416_v46 = vpop.f32.mrf.mxu0 }
 0x29a   :  { %v539_v47 = vpop.f32.mrf.mxu0 }
 0x29b   :  { %424 = vsyncpa [#allocation4], 1 }
 0x29c   :  { %425 = vsyncpa [#allocation6], 1 }

</bundles_post_ra>
